<compile_context>
chip_gen: v7x
topology: tpu7x:2x2x1
jax: 0.10.0
libtpu: 0.0.40
codegen_flags: <defaults>
</compile_context>

<pallas_src>
import functools

import jax
import jax.numpy as jnp
from jax.experimental import pallas as pl
from jax.experimental.pallas import tpu as pltpu

BN_EPS = 1e-5
NEG_SLOPE = 0.01

H1 = 32      # fc1 output width
H2 = 16      # fc2 output width
LANES = 128


def _round_up(n, m):
    return ((n + m - 1) // m) * m


def _param_layout(d):
    """Sublane offsets of each region inside the packed (P_ROWS, 128) buffer.
    Every region (except w1's d rows) starts at a multiple of 8."""
    r_w1 = 0                       # [d,  32]  fc1 weight (BN1-folded)
    r_b1 = _round_up(d, 8)         # [1,  32]  fc1 bias   (BN1-folded)
    r_w2 = r_b1 + 8                # [32, 16]  fc2 weight (BN2-folded)
    r_b2 = r_w2 + H1               # [1,  16]  fc2 bias   (BN2-folded)
    r_w3 = r_b2 + 8                # [16, 1]   fc3 weight (column)
    r_b3 = r_w3 + H2               # [1,  1]   fc3 bias
    p_rows = _round_up(r_b3 + 8, 8)
    return r_w1, r_b1, r_w2, r_b2, r_w3, r_b3, p_rows


def _leaky_relu(x):
    return jnp.where(x >= 0, x, NEG_SLOPE * x)


def _mlp_kernel(x_ref, p_ref, o_ref, *, d, layout):
    # x_ref: [tile_b, d]       batch-major input block (auto-pipelined)
    # p_ref: [P_ROWS, 128]     packed, BN-folded parameters (VMEM-resident)
    # o_ref: [tile_b, 1]       output block in the caller's final layout
    rw1, rb1, rw2, rb2, rw3, rb3 = layout
    x = x_ref[...]

    # Static slices of the single packed param buffer.
    w1 = p_ref[rw1:rw1 + d, 0:H1]      # (d, 32)
    b1 = p_ref[rb1:rb1 + 1, 0:H1]      # (1, 32) -> broadcasts over rows
    w2 = p_ref[rw2:rw2 + H1, 0:H2]     # (32, 16)
    b2 = p_ref[rb2:rb2 + 1, 0:H2]      # (1, 16)
    w3 = p_ref[rw3:rw3 + H2, 0:1]      # (16, 1)
    b3 = p_ref[rb3:rb3 + 1, 0:1]       # (1, 1)

    # fc1 (BN1 folded in) -> leaky_relu.  Dropout1 = identity in eval mode.
    h1 = jnp.dot(x, w1, preferred_element_type=jnp.float32) + b1    # (tb, 32)
    h1 = _leaky_relu(h1)

    # fc2 (BN2 folded in) -> leaky_relu.  Dropout2 = identity in eval mode.
    h2 = jnp.dot(h1, w2, preferred_element_type=jnp.float32) + b2   # (tb, 16)
    h2 = _leaky_relu(h2)

    # fc3: (tb, 16) @ (16, 1) + b3 — output is ~10% of HBM traffic.
    o_ref[...] = jnp.dot(h2, w3, preferred_element_type=jnp.float32) + b3


def pack_params(params):
    """Fold eval-mode BatchNorm into fc1/fc2 and pack all parameters into one
    lane-padded (P_ROWS, 128) f32 buffer (one HBM->VMEM DMA, run once per
    weight set in a serving setup)."""
    f32 = jnp.float32
    w1 = params["w1"].astype(f32)
    d = w1.shape[0]

    s1 = params["g1"] * jax.lax.rsqrt(params["v1"] + BN_EPS)          # (1, 32)
    w1f = w1 * s1                                                      # (d, 32)
    b1f = (params["b1"] - params["m1"]) * s1 + params["be1"]           # (1, 32)

    s2 = params["g2"] * jax.lax.rsqrt(params["v2"] + BN_EPS)           # (1, 16)
    w2f = params["w2"].astype(f32) * s2                                # (32, 16)
    b2f = (params["b2"] - params["m2"]) * s2 + params["be2"]           # (1, 16)

    w3 = params["w3"].astype(f32)                                      # (16, 1)
    b3 = params["b3"].astype(f32)                                      # (1, 1)

    rw1, rb1, rw2, rb2, rw3, rb3, p_rows = _param_layout(d)
    p = jnp.zeros((p_rows, LANES), f32)     # zero pad rows/lanes (correctness!)
    p = p.at[rw1:rw1 + d, 0:H1].set(w1f)
    p = p.at[rb1:rb1 + 1, 0:H1].set(b1f)
    p = p.at[rw2:rw2 + H1, 0:H2].set(w2f)
    p = p.at[rb2:rb2 + 1, 0:H2].set(b2f)
    p = p.at[rw3:rw3 + H2, 0:1].set(w3)
    p = p.at[rb3:rb3 + 1, 0:1].set(b3)
    return p


def diabetes_model_forward(x, params, *, tile_b=None):
    """x: [B, input_dim] float32 -> [B, 1] float32 (eval-mode forward)."""
    B, d = x.shape
    rw1, rb1, rw2, rb2, rw3, rb3, p_rows = _param_layout(d)

    if tile_b is None:
        # Big blocks for HBM efficiency (x-DMA at 4096 rows is ~160 KiB, far
        # inside every generation's VMEM budget), but keep >= ~4 grid steps for
        # large batches so the "parallel" batch axis feeds both v7x TCs.
        tile_b = max(8, min(4096, _round_up((B + 3) // 4, 8)))
    tile_b = min(tile_b, _round_up(B, 8))
    assert tile_b % 8 == 0
    grid_b = pl.cdiv(B, tile_b)   # partial last block: OOB reads are garbage
    #                               rows whose outputs are dropped on write.

    packed = pack_params(params)

    cost = pl.CostEstimate(
        flops=2 * B * (d * H1 + H1 * H2 + H2),
        transcendentals=0,
        bytes_accessed=B * (d + 1) * 4 + p_rows * LANES * 4,
    )

    out = pl.pallas_call(
        functools.partial(_mlp_kernel, d=d,
                          layout=(rw1, rb1, rw2, rb2, rw3, rb3)),
        out_shape=jax.ShapeDtypeStruct((B, 1), jnp.float32),
        grid_spec=pltpu.PrefetchScalarGridSpec(
            num_scalar_prefetch=0,
            grid=(grid_b,),
            in_specs=[
                pl.BlockSpec((tile_b, d), lambda i: (i, 0)),      # pipelined x
                pl.BlockSpec((p_rows, LANES), lambda i: (0, 0)),  # resident params
            ],
            out_specs=pl.BlockSpec((tile_b, 1), lambda i: (i, 0)),
        ),
        compiler_params=pltpu.CompilerParams(
            dimension_semantics=("parallel",),  # batch tiles across v7x's 2 TCs
        ),
        cost_estimate=cost,
    )(x, packed)
    return out  # already in the caller's final (B, 1) layout


def init_params(key, input_dim, h1=H1, h2=H2, out=1):
    ks = jax.random.split(key, 10)
    f32 = jnp.float32

    def lin(kw, kb, d_in, d_out):
        # Weights stored as [d_in, d_out] (pre-transposed vs. PyTorch Linear).
        bound = 1.0 / jnp.sqrt(d_in)
        w = jax.random.uniform(kw, (d_in, d_out), f32, -bound, bound)
        b = jax.random.uniform(kb, (1, d_out), f32, -bound, bound)
        return w, b

    w1, b1 = lin(ks[0], ks[1], input_dim, h1)
    w2, b2 = lin(ks[2], ks[3], h1, h2)
    w3, b3 = lin(ks[4], ks[5], h2, out)

    def bn(kg, km, dim):
        g = 1.0 + 0.1 * jax.random.normal(kg, (1, dim), f32)
        be = 0.05 * jax.random.normal(km, (1, dim), f32)
        m = 0.1 * jax.random.normal(jax.random.fold_in(km, 1), (1, dim), f32)
        v = 1.0 + 0.1 * jax.random.uniform(jax.random.fold_in(kg, 1), (1, dim), f32)
        return g, be, m, v

    g1, be1, m1, v1 = bn(ks[6], ks[7], h1)
    g2, be2, m2, v2 = bn(ks[8], ks[9], h2)

    return dict(
        w1=w1, b1=b1, g1=g1, be1=be1, m1=m1, v1=v1,
        w2=w2, b2=b2, g2=g2, be2=be2, m2=m2, v2=v2,
        w3=w3, b3=b3,
    )


def reference_forward(x, p):
    # Pure-JAX reference of the same eval-mode forward pass (unfolded BN).
    h1 = x @ p["w1"] + p["b1"]
    h1 = (h1 - p["m1"]) * jax.lax.rsqrt(p["v1"] + BN_EPS) * p["g1"] + p["be1"]
    h1 = jnp.where(h1 >= 0, h1, NEG_SLOPE * h1)
    h2 = h1 @ p["w2"] + p["b2"]
    h2 = (h2 - p["m2"]) * jax.lax.rsqrt(p["v2"] + BN_EPS) * p["g2"] + p["be2"]
    h2 = jnp.where(h2 >= 0, h2, NEG_SLOPE * h2)
    return h2 @ p["w3"] + p["b3"]


if __name__ == "__main__":
    key = jax.random.PRNGKey(0)
    k_x, k_p = jax.random.split(key)

    batch = 64       # default tile heuristic -> tile_b=16, 4 grid steps
    input_dim = 10   # diabetes feature count

    x = jax.random.normal(k_x, (batch, input_dim), jnp.float32)
    params = init_params(k_p, input_dim)

    out = jax.block_until_ready(diabetes_model_forward(x, params))
    ref = reference_forward(x, params)

    assert out.shape == (batch, 1)
    # Tolerance leaves headroom for MXU f32 pass decomposition on the tiny
    # contractions (K = 10/32/16); outputs are O(1).
    assert jnp.allclose(out, ref, atol=2e-3, rtol=2e-3), "mismatch vs reference"

    print("KERNEL_OK")
</pallas_src>

<mosaic_0001>
module attributes {stable_mosaic.version = 11 : i64} {
  func.func @_mlp_kernel(%arg0: i32, %arg1: memref<16x10xf32, #tpu.memory_space<vmem>>, %arg2: memref<88x128xf32, #tpu.memory_space<vmem>>, %arg3: memref<16x1xf32, #tpu.memory_space<vmem>>) attributes {dimension_semantics = [#tpu.dimension_semantics<parallel>], iteration_bounds = array<i64: 4>, scalar_prefetch = 0 : i64, scratch_operands = 0 : i64, tpu.core_type = #tpu.core_type<tc>, window_params = [{transform_indices = @transform_0, window_bounds = array<i64: 16, 10>}, {pipeline_mode = #tpu.pipeline_mode<synchronous>, transform_indices = @transform_1, window_bounds = array<i64: 88, 128>}, {transform_indices = @transform_2, window_bounds = array<i64: 16, 1>}]} {
    %c0 = arith.constant 0 : index
    %c0_0 = arith.constant 0 : index
    %0 = vector.load %arg1[%c0, %c0_0] : memref<16x10xf32, #tpu.memory_space<vmem>>, vector<16x10xf32>
    %c0_1 = arith.constant 0 : index
    %c0_2 = arith.constant 0 : index
    %1 = vector.load %arg2[%c0_1, %c0_2] : memref<88x128xf32, #tpu.memory_space<vmem>>, vector<10x32xf32>
    %c16 = arith.constant 16 : index
    %c0_3 = arith.constant 0 : index
    %2 = vector.load %arg2[%c16, %c0_3] : memref<88x128xf32, #tpu.memory_space<vmem>>, vector<1x32xf32>
    %c24 = arith.constant 24 : index
    %c0_4 = arith.constant 0 : index
    %3 = vector.load %arg2[%c24, %c0_4] : memref<88x128xf32, #tpu.memory_space<vmem>>, vector<32x16xf32>
    %c56 = arith.constant 56 : index
    %c0_5 = arith.constant 0 : index
    %4 = vector.load %arg2[%c56, %c0_5] : memref<88x128xf32, #tpu.memory_space<vmem>>, vector<1x16xf32>
    %c64 = arith.constant 64 : index
    %c0_6 = arith.constant 0 : index
    %5 = vector.load %arg2[%c64, %c0_6] : memref<88x128xf32, #tpu.memory_space<vmem>>, vector<16x1xf32>
    %c80 = arith.constant 80 : index
    %c0_7 = arith.constant 0 : index
    %6 = vector.load %arg2[%c80, %c0_7] : memref<88x128xf32, #tpu.memory_space<vmem>>, vector<1x1xf32>
    %cst = arith.constant dense<0.000000e+00> : vector<16x32xf32>
    %7 = tpu.matmul %0, %1, %cst {dimension_numbers = #tpu.dot_dimension_numbers<[1], [0], [0], [1], [0, 0, 1, 1], [], []>} : vector<16x10xf32>, vector<10x32xf32>, vector<16x32xf32> -> vector<16x32xf32>
    %8 = vector.broadcast %2 : vector<1x32xf32> to vector<16x32xf32>
    %9 = arith.addf %7, %8 : vector<16x32xf32>
    %cst_8 = arith.constant 0.000000e+00 : f32
    %10 = vector.broadcast %cst_8 : f32 to vector<16x32xf32>
    %11 = arith.cmpf oge, %9, %10 : vector<16x32xf32>
    %cst_9 = arith.constant 0.00999999977 : f32
    %12 = vector.broadcast %cst_9 : f32 to vector<16x32xf32>
    %13 = arith.mulf %12, %9 : vector<16x32xf32>
    %14 = arith.select %11, %9, %13 : vector<16x32xi1>, vector<16x32xf32>
    %cst_10 = arith.constant dense<0.000000e+00> : vector<16x16xf32>
    %15 = tpu.matmul %14, %3, %cst_10 {dimension_numbers = #tpu.dot_dimension_numbers<[1], [0], [0], [1], [0, 0, 1, 1], [], []>} : vector<16x32xf32>, vector<32x16xf32>, vector<16x16xf32> -> vector<16x16xf32>
    %16 = vector.broadcast %4 : vector<1x16xf32> to vector<16x16xf32>
    %17 = arith.addf %15, %16 : vector<16x16xf32>
    %cst_11 = arith.constant 0.000000e+00 : f32
    %18 = vector.broadcast %cst_11 : f32 to vector<16x16xf32>
    %19 = arith.cmpf oge, %17, %18 : vector<16x16xf32>
    %cst_12 = arith.constant 0.00999999977 : f32
    %20 = vector.broadcast %cst_12 : f32 to vector<16x16xf32>
    %21 = arith.mulf %20, %17 : vector<16x16xf32>
    %22 = arith.select %19, %17, %21 : vector<16x16xi1>, vector<16x16xf32>
    %cst_13 = arith.constant dense<0.000000e+00> : vector<16x1xf32>
    %23 = tpu.matmul %22, %5, %cst_13 {dimension_numbers = #tpu.dot_dimension_numbers<[1], [0], [0], [1], [0, 0, 1, 1], [], []>} : vector<16x16xf32>, vector<16x1xf32>, vector<16x1xf32> -> vector<16x1xf32>
    %24 = vector.broadcast %6 : vector<1x1xf32> to vector<16x1xf32>
    %25 = arith.addf %23, %24 : vector<16x1xf32>
    %c0_14 = arith.constant 0 : index
    %c0_15 = arith.constant 0 : index
    %26 = vector.load %arg3[%c0_14, %c0_15] : memref<16x1xf32, #tpu.memory_space<vmem>>, vector<16x1xf32>
    tpu.vector_store %arg3[%c0_14, %c0_15], %25 {strides = array<i32>} : memref<16x1xf32, #tpu.memory_space<vmem>>, vector<16x1xf32>,
    return
  }
  func.func @transform_0(%arg0: i32) -> (i32, i32) {
    %c0_i32 = arith.constant 0 : i32
    %c0_i32_0 = arith.constant 0 : i32
    return %arg0, %c0_i32 : i32, i32
  }
  func.func @transform_1(%arg0: i32) -> (i32, i32) {
    %c0_i32 = arith.constant 0 : i32
    %c0_i32_0 = arith.constant 0 : i32
    %c0_i32_1 = arith.constant 0 : i32
    return %c0_i32, %c0_i32_0 : i32, i32
  }
  func.func @transform_2(%arg0: i32) -> (i32, i32) {
    %c0_i32 = arith.constant 0 : i32
    %c0_i32_0 = arith.constant 0 : i32
    return %arg0, %c0_i32 : i32, i32
  }
}

</mosaic_0001>

<bundles_post_ra>
// kernel: tpu_custom_call.1
= control target key start
LH: loop header
LB: loop body
LE: loop exit
PB: predicated region body
PF: predicated region fallthrough
CT: control target
= control target key end

     0   :  { %7 = vsyncpa [#allocation3], 0  ;;  %s681_s9 = smov 0   ;;  %s747_s0 = inlined_call_operand.vmem [shape: f32[64,10], index: 0, kind: input, shape index: {}]   ;;  %s748_s1 = inlined_call_operand.hbm [shape: f32[88,128], index: 1, kind: input, shape index: {}]   ;;  %s749_s2 = inlined_call_operand.vmem [shape: f32[64,1], index: 2, kind: output, shape index: {}]  }
   0x1 LB: > { %s520_s10 = sadd.s32 4294967295, %s660_s9   ;;  %p522_p0 = scmp.ge.s32.totalorder %s660_s9, 1  ;;  %s660_s9 = sphi %s681_s9, %s13_s9  }
   0x2   : > { %p91_p1 = scmp.lt.s32.totalorder %s660_s9, 5  ;;  %s662_s11 = smov [#allocation2]  }
   0x3   : > { %s103_s12 = sshll.u32 %s662_s11, 4  ;;  %p695_p3 = scmp.eq.s32.totalorder %s520_s10, 0  ;;  %s104_s12 = int_to_ptr.vmem [resolvable:$true] %s103_s12 }
   0x4   : > { %p689_p2 = pnand %p522_p0, %p91_p1  ;;  %s622_s18 = scalar_lea.hbm %s748_s1, 1408 }
   0x5   : > { %s754_s14 = scalar_select %p695_p3, 1, 0 }
   0x6   : > { %s753_s13 = scalar_select %p689_p2, 1, 0 }
   0x7   : > { %p604_p4 = pneg %p689_p2  ;;  %p623_p6 = scmp.ne.s32.totalorder %s748_s1, %s622_s18 }
   0x8   : > { %p629_p10 = scmp.lt.u32.totalorder %s622_s18, %s748_s1 }
   0x9   : > { %p703_p5 = pnand %p695_p3, %p604_p4 }
   0xb   : > { %p624_p7 = pneg %p703_p5 }
   0xd   : > { %p625_p8 = pnand %p624_p7, %p623_p6 }
   0xf   : > { %p626_p9 = pneg %p625_p8 }
  0x11   : > { %p631_p11 = pnand %p629_p10, %p626_p9 }
  0x13   : > { %634 = shalt.err (!%p631_p11)
}
  0x14   : > { %s635_s23 = scalar_lea.vmem %s104_s12, 1408  ;;  %p643_p1 = scmp.lt.s32.totalorder %s104_s12, %s104_s12 }
  0x15   : > { %p636_p12 = scmp.ne.s32.totalorder %s104_s12, %s635_s23  ;;  %p644_p4 = scmp.lt.s32.totalorder %s635_s23, %s635_s23 }
  0x17   : > { %p638_p13 = pnand %p636_p12, %p624_p7  ;;  %p645_p3 = por %p644_p4, %p643_p1 }
  0x19   : > { %p639_p0 = pneg %p638_p13 }
  0x1b   : > { %p646_p2 = pnand %p645_p3, %p639_p0 }
  0x1d   : > { %649 = shalt.err (!%p646_p2)
}
  0x1e   : > { %s663_s24 = smov 128   ;;  %s664_s25 = smov 8  }
  0x1f   : > { %607 = dma.hbm_to_vmem [thread:$0]  (!%p703_p5), %s748_s1, 1408, %s104_s12, [#allocation3], %s663_s24, %s663_s24, %s664_s25  }
  0x20   : > { %p756_p6 = scmp.ne.s32.totalorder %s753_s13, 0 }
  0x21   : > { %p757_p8 = scmp.ne.s32.totalorder (!%p756_p6), %s754_s14, 0 }
  0x22   : > { %128 = sbr.rel (%p756_p6) target bundleno = 704 (0x2c0), region = 28 }
  0x29   : > { %655 = dma.done.wait (%p757_p8), [#allocation3], 1408  }
  0x2a   : > { %657 = vsyncadd (%p757_p8), [#allocation3], 4294965888  ;;  %s527_s28 = sshll.u32 %s520_s10, 1  ;;  %vm186_vm0 = vcmask 1041408   ;;  %vm179_vm1 = vcmask 80896   ;;  %vm665_vm2 = vmmov 1  }
  0x2b   : > { %p151_p2 = scmp.lt.s32.totalorder %s527_s28, 7  ;;  %vm583_vm3 = vmpackc.low %vm186_vm0, %vm665_vm2  ;;  %v164_v0 = vld [vmem:[#allocation2] sm:$0xff]  ;;  %v165_v1 = vld [vmem:[#allocation2 + $0x8] sm:$0x3]  ;;  %vm275_vm6 = vcmask 261120   ;;  %vm367_vm9 = vcmask 130048  }
  0x2c   : > { %v582_v3 = vpack.c.bf16 %v165_v1, %v164_v0  ;;  %v167_v5 = vld [vmem:[#allocation2 + $0x18] sm:$0xff]  ;;  %v168_v6 = vld [vmem:[#allocation2 + $0x20] sm:$0xff]  ;;  %v169_v8 = vld [vmem:[#allocation2 + $0x28] sm:$0xff]  ;;  %vm449_vm10 = vcmask 7168  }
  0x2d   : > { %s759_s28 = smov (!%p151_p2, %s527_s28), 7  ;;  %v588_v7 = vpack.c.bf16 %v168_v6, %v167_v5  ;;  %v170_v9 = vld [vmem:[#allocation2 + $0x30] sm:$0xff]  ;;  %v172_v20 = vld [vmem:[#allocation2 + $0x40] sm:$0xff]  ;;  %v173_v21 = vld [vmem:[#allocation2 + $0x48] sm:$0xff] }
  0x2e   : > { %s528_s29 = sshll.u32 %s759_s28, 3  ;;  %584 = vmatprep.subr.msk.bf16.mxu0 %vm583_vm3, %v582_v3  ;;  %v592_v10 = vpack.c.bf16 %v170_v9, %v169_v8  ;;  %v531_v11 = vld [vmem:[#allocation2 + $0x10] ss:$0 sm:$0xff]  ;;  %v596_v22 = vpack.c.bf16 %v173_v21, %v172_v20  ;;  %v535_v23 = vld [vmem:[#allocation2 + $0x38] ss:$0 sm:$0xff] }
  0x2f   : > { %s154_s4 = scalar_lea.vmem %s747_s0, %s528_s29  ;;  %587 = vmatpush3.bf16.msk.msra.mxu0 %vm583_vm3, %v582_v3  ;;  %589 = vmatprep.subr.bf16.mxu1 %v588_v7  ;;  %v538_v32 = vld [vmem:[#allocation2 + $0x50] ss:$0 sm:$0xff]  ;;  %s160_s7 = scalar_lea.vmem %s749_s2, %s528_s29 }
  0x30   : > { %v162_v2 = vld [vmem:[%s154_s4] sm:$0xff]  ;;  %v163_v4 = vld [vmem:[%s154_s4 + $0x8] sm:$0xff]  ;;  %591 = vmatpush3.bf16.msra.mxu1 %v588_v7  ;;  %597 = vmatprep.subr.bf16.mxu0 %v596_v22 }
  0x31   : > { %561 = vmatprep.mubr.msk.f32.mxu0 %vm179_vm1, %v162_v2  ;;  %593 = vmatprep.subr.bf16.mxu1 %v592_v10 }
  0x32   : > { %562 = vmatmul.mubr.msk.f32.vlgmr.msra.gmra.mrb[0].mxu0 %vm179_vm1, %v163_v4 }
  0x33   : > { %599 = vmatpush3.bf16.msra.mxu0 %v596_v22 }
  0x34   : > { %595 = vmatpush3.bf16.msra.mxu1 %v592_v10 }
 0x105   : > { %v563_v12 = vpop.f32.mrb[0].mxu0 }
 0x106   : > { %v262_v13 = vadd.f32 %v563_v12, %v531_v11  ;;  %v256_v14 = vpop.f32.mrb[1].mxu0 }
 0x107   : > { %v257_v15 = vadd.f32 %v531_v11, %v256_v14 }
 0x108   : > { %v268_v16 = vmul.f32 0.01, %v262_v13  ;;  %vm266_vm4 = vcmp.ge.f32.partialorder %v262_v13, 0.0 }
 0x109   : > { %vm265_vm5 = vcmp.ge.f32.partialorder %v257_v15, 0.0  ;;  %v267_v17 = vmul.f32 0.01, %v257_v15 }
 0x10a   : > { %v270_v19 = vsel %vm266_vm4, %v262_v13, %v268_v16 }
 0x10b   : > { %v269_v18 = vsel %vm265_vm5, %v257_v15, %v267_v17 }
 0x10c   : > { %572 = vmatprep.mubr.msk.f32.mxu1 %vm275_vm6, %v269_v18 }
 0x10d   : > { %573 = vmatmul.mubr.msk.f32.vlgmr.msra.gmra.mrb[0].mxu1 %vm275_vm6, %v270_v19 }
 0x1e0   : > { %v574_v24 = vpop.f32.mrb[0].mxu1 }
 0x1e1   : > { %v354_v25 = vadd.f32 %v574_v24, %v535_v23  ;;  %v348_v26 = vpop.f32.mrb[1].mxu1 }
 0x1e2   : > { %v349_v27 = vadd.f32 %v535_v23, %v348_v26 }
 0x1e3   : > { %v360_v28 = vmul.f32 0.01, %v354_v25  ;;  %vm358_vm7 = vcmp.ge.f32.partialorder %v354_v25, 0.0 }
 0x1e4   : > { %vm357_vm8 = vcmp.ge.f32.partialorder %v349_v27, 0.0  ;;  %v359_v29 = vmul.f32 0.01, %v349_v27 }
 0x1e5   : > { %v362_v31 = vsel %vm358_vm7, %v354_v25, %v360_v28 }
 0x1e6   : > { %v361_v30 = vsel %vm357_vm8, %v349_v27, %v359_v29 }
 0x1e7   : > { %579 = vmatprep.mubr.msk.f32.mxu0 %vm367_vm9, %v361_v30 }
 0x1e8   : > { %580 = vmatmul.mubr.msk.f32.vlgmr.msra.gmra.mrb[2].mxu0 %vm367_vm9, %v362_v31 }
 0x2bb   : > { %v581_v33 = vpop.f32.mrb[2].mxu0 }
 0x2bc   : > { %v440_v34 = vpop.f32.mrb[3].mxu0  ;;  %v446_v36 = vadd.f32 %v581_v33, %v538_v32 }
 0x2bd   : > { %v441_v35 = vadd.f32 %v538_v32, %v440_v34 }
 0x2be   : > { %451 = vst.msk [vmem:[%s160_s7 + $0x8] sm:$0xff] %vm449_vm10, %v446_v36 }
 0x2bf   : > { %450 = vst.msk [vmem:[%s160_s7] sm:$0xff] %vm449_vm10, %v441_v35 }
 0x2c0 PF: > { %s13_s9 = sadd.s32 1, %s660_s9  }
 0x2c1   : > { %p10_p3 = scmp.ge.s32.totalorder %s13_s9, 6  }
 0x2c3   :  { %12 = sbr.rel (!%p10_p3) target bundleno = 1 (0x1), region = 63 }
 0x2ca   :  { %474 = vsyncpa [#allocation3], 1 }
 0x2cb   :  { %476 = vsyncpa [#allocation3 + $0x1], 1 }

</bundles_post_ra>
